<compile_context>
chip_gen: v5e
topology: v5e:2x2
jax: 0.10.0
libtpu: 0.0.40
codegen_flags: <defaults>
</compile_context>

<pallas_src>
import functools

import jax
import jax.numpy as jnp
from jax.experimental import pallas as pl
from jax.experimental.pallas import tpu as pltpu


# ----------------------------- fused Pallas kernel ----------------------------


def _fused_model_kernel(x_ref, w_ref, b_ref, o_ref, *, dilations, kernel_size,
                        seq_len, margin):
    """Normalize over time + 4 dilated conv/bias/ReLU stages, fully VMEM-resident.

    x_ref : (Bb, L + 2*margin, C)   zero-padded input block (margin = sum of pads)
    w_ref : (n_conv, K*C, C)        stacked conv weights, tap-major rows
    b_ref : (n_conv, 1, C)          stacked biases
    o_ref : (Bb, L, C)              output block (TCN activations)
    """
    Bb, L0, C = x_ref.shape
    L = seq_len
    K = kernel_size
    n_conv = len(dilations)
    inv_L = 1.0 / L

    # Weights / biases loaded from VMEM once, reused for every batch element.
    w_all = [w_ref[j].astype(jnp.float32) for j in range(n_conv)]
    b_all = [b_ref[j].astype(jnp.float32) for j in range(n_conv)]

    for b in range(Bb):                                    # static unroll over batch block
        xb = x_ref[b].astype(jnp.float32)                  # (L0, C); zero outside the band
        row0 = jax.lax.broadcasted_iota(jnp.int32, (L0, C), 0)
        band0 = (row0 >= margin) & (row0 < margin + L)

        # ---- normalization over time (mean / var(unbiased=False), eps=1e-5) ----
        mean = jnp.sum(xb, axis=0, keepdims=True) * inv_L  # padded rows are exactly zero
        xc = jnp.where(band0, xb - mean, 0.0)
        var = jnp.sum(xc * xc, axis=0, keepdims=True) * inv_L
        g = xc * jax.lax.rsqrt(var + 1e-5)                 # (L0, C); zero outside band

        # ---- TCN: [dilated 'same' conv -> bias -> ReLU] x 4, margin shrinks per stage ----
        m = margin
        for j, d in enumerate(dilations):                  # static unroll (4 stages)
            pad = (K - 1) * d // 2
            Lin = g.shape[0]
            Lout = Lin - 2 * pad
            # K shifted views fused along lanes -> single (Lout, K*C) x (K*C, C) matmul.
            taps = [jax.lax.slice(g, (k * d, 0), (k * d + Lout, C)) for k in range(K)]
            hcat = jnp.concatenate(taps, axis=1)           # (Lout, K*C)
            act = jnp.dot(hcat, w_all[j],
                          preferred_element_type=jnp.float32) + b_all[j]
            act = jnp.maximum(act, 0.0)                    # fused bias + ReLU
            m -= pad
            if m > 0:
                # Re-zero the remaining margin so the next stage sees 'same' zero padding.
                row = jax.lax.broadcasted_iota(jnp.int32, (Lout, C), 0)
                act = jnp.where((row >= m) & (row < m + L), act, 0.0)
            g = act                                        # (Lout, C)

        o_ref[b] = g.astype(o_ref.dtype)                   # m == 0 here, g is (L, C)


# ----------------------------- wrapper (glue) ---------------------------------


def model_forward(params, x_enc, x_mark_enc=None, x_dec=None, x_mark_dec=None,
                  *, batch_block=None):
    """short_term_forecast path of Model (up to the undefined Informer stack).

    One pallas_call (single grid step by default) for normalize + the entire TCN.
    x_enc: (B, L, C).
    """
    B, L, C = x_enc.shape
    tcn = params["tcn"]
    K = tcn[0]["w1"].shape[0]
    assert K % 2 == 1, "symmetric 'same' padding assumes odd kernel_size"

    ws, bs, dils = [], [], []
    for i, blk in enumerate(tcn):
        d = 2 ** i
        for wk, bk in (("w1", "b1"), ("w2", "b2")):
            w = blk[wk]
            assert w.shape == (K, C, C), "fused kernel assumes Cin == Cout == enc_in"
            ws.append(w.reshape(K * C, C))                 # tap-major: rows k*C+i = w[k,i,:]
            bs.append(blk[bk].reshape(1, C))
            dils.append(d)
    n_conv = len(ws)
    W = jnp.stack(ws, axis=0)                              # (n_conv, K*C, C)
    Bs = jnp.stack(bs, axis=0)                             # (n_conv, 1, C)

    pads = [(K - 1) * d // 2 for d in dils]
    margin = sum(pads)
    # One-time zero margin covering every stage's 'same' padding; the kernel never needs
    # a pad scratch or per-stage zero stores (the margin shrinks by pad_j per stage).
    x_pad = jnp.pad(x_enc, ((0, 0), (margin, margin), (0, 0)))
    L0 = L + 2 * margin

    if batch_block is None:
        batch_block = B            # one grid step: step overhead >> compute at this size
    assert B % batch_block == 0
    nb = B // batch_block

    kernel = functools.partial(_fused_model_kernel, dilations=tuple(dils),
                               kernel_size=K, seq_len=L, margin=margin)
    tcn_out = pl.pallas_call(
        kernel,
        out_shape=jax.ShapeDtypeStruct((B, L, C), x_enc.dtype),
        grid=(nb,),
        in_specs=[
            pl.BlockSpec((batch_block, L0, C), lambda i: (i, 0, 0)),
            pl.BlockSpec((n_conv, K * C, C), lambda i: (0, 0, 0)),
            pl.BlockSpec((n_conv, 1, C), lambda i: (0, 0, 0)),
        ],
        out_specs=pl.BlockSpec((batch_block, L, C), lambda i: (i, 0, 0)),
        compiler_params=pltpu.CompilerParams(dimension_semantics=("parallel",)),
    )(x_pad, W, Bs)

    # TODO(synk): enc_embedding / encoder / decoder / (dec_out*std+mean) — class
    #             definitions (DataEmbedding, ProbAttention, ...) are not provided.
    return tcn_out


# ----------------------------- parameter init --------------------------------


def init_params(key, enc_in, num_layers=2, kernel_size=3):
    # num_channels = [enc_in] + [enc_in]*(num_layers-1) + [enc_in]
    chans = [enc_in] * (num_layers + 1)
    tcn = []
    for i in range(num_layers):
        cin, cout = chans[i], chans[i + 1]
        bound = 1.0 / jnp.sqrt(cin * kernel_size)
        key, k1, k2, k3, k4 = jax.random.split(key, 5)
        blk = {
            "w1": jax.random.uniform(k1, (kernel_size, cin, cout), jnp.float32, -bound, bound),
            "b1": jax.random.uniform(k2, (cout,), jnp.float32, -bound, bound),
            "w2": jax.random.uniform(k3, (kernel_size, cout, cout), jnp.float32, -bound, bound),
            "b2": jax.random.uniform(k4, (cout,), jnp.float32, -bound, bound),
        }
        tcn.append(blk)
    return {"tcn": tcn}


# ----------------------------- reference (checks) -----------------------------


def _conv1d_ref(x, w, b, dilation):
    pad = (w.shape[0] - 1) * dilation // 2
    out = jax.lax.conv_general_dilated(
        x, w, window_strides=(1,), padding=[(pad, pad)],
        rhs_dilation=(dilation,), dimension_numbers=("NWC", "WIO", "NWC"))
    return out + b[None, None, :]


def _model_ref(params, x):
    mean = jnp.mean(x, axis=1, keepdims=True)
    xc = x - mean
    std = jnp.sqrt(jnp.mean(xc * xc, axis=1, keepdims=True) + 1e-5)
    h = xc / std
    for i, blk in enumerate(params["tcn"]):
        d = 2 ** i
        h = jnp.maximum(_conv1d_ref(h, blk["w1"], blk["b1"], d), 0.0)
        h = jnp.maximum(_conv1d_ref(h, blk["w2"], blk["b2"], d), 0.0)
    return h


# ------------------------------------ main ------------------------------------

if __name__ == "__main__":
    key = jax.random.PRNGKey(0)
    B, L, C = 2, 16, 8          # batch, seq_len, enc_in (= hidden_size of the TCN)

    k_par, k_x, k_mark = jax.random.split(key, 3)
    params = init_params(k_par, enc_in=C, num_layers=2, kernel_size=3)

    x_enc = jax.random.normal(k_x, (B, L, C), jnp.float32)
    x_mark_enc = jax.random.normal(k_mark, (B, L, 4), jnp.float32)   # unused (see TODO)
    x_dec = jnp.zeros((B, L, C), jnp.float32)                         # unused
    x_mark_dec = jnp.zeros((B, L, 4), jnp.float32)                    # unused

    fwd = jax.jit(model_forward)
    out = fwd(params, x_enc, x_mark_enc, x_dec, x_mark_dec)
    out = jax.block_until_ready(out)

    ref = _model_ref(params, x_enc)
    assert out.shape == (B, L, C)
    assert jnp.allclose(out, ref, rtol=1e-4, atol=1e-4), "mismatch vs JAX reference"

    print("KERNEL_OK")
</pallas_src>

<mosaic_0001>
module attributes {stable_mosaic.version = 11 : i64} {
  func.func @_fused_model_kernel(%arg0: i32, %arg1: memref<2x28x8xf32, #tpu.memory_space<vmem>>, %arg2: memref<4x24x8xf32, #tpu.memory_space<vmem>>, %arg3: memref<4x1x8xf32, #tpu.memory_space<vmem>>, %arg4: memref<2x16x8xf32, #tpu.memory_space<vmem>>) attributes {dimension_semantics = [#tpu.dimension_semantics<parallel>], iteration_bounds = array<i64: 1>, scalar_prefetch = 0 : i64, scratch_operands = 0 : i64, tpu.core_type = #tpu.core_type<tc>, window_params = [{transform_indices = @transform_0, window_bounds = array<i64: 2, 28, 8>}, {pipeline_mode = #tpu.pipeline_mode<synchronous>, transform_indices = @transform_1, window_bounds = array<i64: 4, 24, 8>}, {pipeline_mode = #tpu.pipeline_mode<synchronous>, transform_indices = @transform_2, window_bounds = array<i64: 4, 1, 8>}, {transform_indices = @transform_3, window_bounds = array<i64: 2, 16, 8>}]} {
    %c0 = arith.constant 0 : index
    %c0_0 = arith.constant 0 : index
    %c0_1 = arith.constant 0 : index
    %0 = vector.load %arg2[%c0, %c0_0, %c0_1] : memref<4x24x8xf32, #tpu.memory_space<vmem>>, vector<1x24x8xf32>
    %1 = vector.shape_cast %0 : vector<1x24x8xf32> to vector<24x8xf32>
    %c1 = arith.constant 1 : index
    %c0_2 = arith.constant 0 : index
    %c0_3 = arith.constant 0 : index
    %2 = vector.load %arg2[%c1, %c0_2, %c0_3] : memref<4x24x8xf32, #tpu.memory_space<vmem>>, vector<1x24x8xf32>
    %3 = vector.shape_cast %2 : vector<1x24x8xf32> to vector<24x8xf32>
    %c2 = arith.constant 2 : index
    %c0_4 = arith.constant 0 : index
    %c0_5 = arith.constant 0 : index
    %4 = vector.load %arg2[%c2, %c0_4, %c0_5] : memref<4x24x8xf32, #tpu.memory_space<vmem>>, vector<1x24x8xf32>
    %5 = vector.shape_cast %4 : vector<1x24x8xf32> to vector<24x8xf32>
    %c3 = arith.constant 3 : index
    %c0_6 = arith.constant 0 : index
    %c0_7 = arith.constant 0 : index
    %6 = vector.load %arg2[%c3, %c0_6, %c0_7] : memref<4x24x8xf32, #tpu.memory_space<vmem>>, vector<1x24x8xf32>
    %7 = vector.shape_cast %6 : vector<1x24x8xf32> to vector<24x8xf32>
    %c0_8 = arith.constant 0 : index
    %c0_9 = arith.constant 0 : index
    %c0_10 = arith.constant 0 : index
    %8 = vector.load %arg3[%c0_8, %c0_9, %c0_10] : memref<4x1x8xf32, #tpu.memory_space<vmem>>, vector<1x1x8xf32>
    %9 = vector.shape_cast %8 : vector<1x1x8xf32> to vector<1x8xf32>
    %c1_11 = arith.constant 1 : index
    %c0_12 = arith.constant 0 : index
    %c0_13 = arith.constant 0 : index
    %10 = vector.load %arg3[%c1_11, %c0_12, %c0_13] : memref<4x1x8xf32, #tpu.memory_space<vmem>>, vector<1x1x8xf32>
    %11 = vector.shape_cast %10 : vector<1x1x8xf32> to vector<1x8xf32>
    %c2_14 = arith.constant 2 : index
    %c0_15 = arith.constant 0 : index
    %c0_16 = arith.constant 0 : index
    %12 = vector.load %arg3[%c2_14, %c0_15, %c0_16] : memref<4x1x8xf32, #tpu.memory_space<vmem>>, vector<1x1x8xf32>
    %13 = vector.shape_cast %12 : vector<1x1x8xf32> to vector<1x8xf32>
    %c3_17 = arith.constant 3 : index
    %c0_18 = arith.constant 0 : index
    %c0_19 = arith.constant 0 : index
    %14 = vector.load %arg3[%c3_17, %c0_18, %c0_19] : memref<4x1x8xf32, #tpu.memory_space<vmem>>, vector<1x1x8xf32>
    %15 = vector.shape_cast %14 : vector<1x1x8xf32> to vector<1x8xf32>
    %c0_20 = arith.constant 0 : index
    %c0_21 = arith.constant 0 : index
    %c0_22 = arith.constant 0 : index
    %16 = vector.load %arg1[%c0_20, %c0_21, %c0_22] : memref<2x28x8xf32, #tpu.memory_space<vmem>>, vector<1x28x8xf32>
    %17 = vector.shape_cast %16 : vector<1x28x8xf32> to vector<28x8xf32>
    %18 = tpu.iota {dimensions = array<i32: 0>} : vector<28x8xi32>
    %c6_i32 = arith.constant 6 : i32
    %19 = vector.broadcast %c6_i32 : i32 to vector<28x8xi32>
    %20 = arith.cmpi sge, %18, %19 : vector<28x8xi32>
    %c22_i32 = arith.constant 22 : i32
    %21 = vector.broadcast %c22_i32 : i32 to vector<28x8xi32>
    %22 = arith.cmpi slt, %18, %21 : vector<28x8xi32>
    %23 = arith.andi %20, %22 : vector<28x8xi1>
    %cst = arith.constant dense<0.000000e+00> : vector<8xf32>
    %24 = vector.multi_reduction <add>, %17, %cst [0] : vector<28x8xf32> to vector<8xf32>
    %25 = vector.shape_cast %24 : vector<8xf32> to vector<1x8xf32>
    %cst_23 = arith.constant 6.250000e-02 : f32
    %26 = vector.broadcast %cst_23 : f32 to vector<1x8xf32>
    %27 = arith.mulf %25, %26 : vector<1x8xf32>
    %28 = vector.broadcast %27 : vector<1x8xf32> to vector<28x8xf32>
    %29 = arith.subf %17, %28 : vector<28x8xf32>
    %cst_24 = arith.constant 0.000000e+00 : f32
    %30 = vector.broadcast %cst_24 : f32 to vector<28x8xf32>
    %31 = arith.select %23, %29, %30 : vector<28x8xi1>, vector<28x8xf32>
    %32 = arith.mulf %31, %31 : vector<28x8xf32>
    %cst_25 = arith.constant dense<0.000000e+00> : vector<8xf32>
    %33 = vector.multi_reduction <add>, %32, %cst_25 [0] : vector<28x8xf32> to vector<8xf32>
    %34 = vector.shape_cast %33 : vector<8xf32> to vector<1x8xf32>
    %cst_26 = arith.constant 6.250000e-02 : f32
    %35 = vector.broadcast %cst_26 : f32 to vector<1x8xf32>
    %36 = arith.mulf %34, %35 : vector<1x8xf32>
    %cst_27 = arith.constant 9.99999974E-6 : f32
    %37 = vector.broadcast %cst_27 : f32 to vector<1x8xf32>
    %38 = arith.addf %36, %37 : vector<1x8xf32>
    %39 = math.rsqrt %38 : vector<1x8xf32>
    %40 = vector.broadcast %39 : vector<1x8xf32> to vector<28x8xf32>
    %41 = arith.mulf %31, %40 : vector<28x8xf32>
    %42 = vector.extract_strided_slice %41 {offsets = [0, 0], sizes = [26, 8], strides = [1, 1]} : vector<28x8xf32> to vector<26x8xf32>
    %43 = vector.extract_strided_slice %41 {offsets = [1, 0], sizes = [26, 8], strides = [1, 1]} : vector<28x8xf32> to vector<26x8xf32>
    %44 = vector.extract_strided_slice %41 {offsets = [2, 0], sizes = [26, 8], strides = [1, 1]} : vector<28x8xf32> to vector<26x8xf32>
    %45 = tpu.concatenate %42, %43, %44 in 1 : vector<26x8xf32>, vector<26x8xf32>, vector<26x8xf32> -> vector<26x24xf32>
    %cst_28 = arith.constant dense<0.000000e+00> : vector<26x8xf32>
    %46 = tpu.matmul %45, %1, %cst_28 {dimension_numbers = #tpu.dot_dimension_numbers<[1], [0], [0], [1], [0, 0, 1, 1], [], []>} : vector<26x24xf32>, vector<24x8xf32>, vector<26x8xf32> -> vector<26x8xf32>
    %47 = vector.broadcast %9 : vector<1x8xf32> to vector<26x8xf32>
    %48 = arith.addf %46, %47 : vector<26x8xf32>
    %cst_29 = arith.constant 0.000000e+00 : f32
    %49 = vector.broadcast %cst_29 : f32 to vector<26x8xf32>
    %50 = arith.maximumf %48, %49 : vector<26x8xf32>
    %51 = tpu.iota {dimensions = array<i32: 0>} : vector<26x8xi32>
    %c5_i32 = arith.constant 5 : i32
    %52 = vector.broadcast %c5_i32 : i32 to vector<26x8xi32>
    %53 = arith.cmpi sge, %51, %52 : vector<26x8xi32>
    %c21_i32 = arith.constant 21 : i32
    %54 = vector.broadcast %c21_i32 : i32 to vector<26x8xi32>
    %55 = arith.cmpi slt, %51, %54 : vector<26x8xi32>
    %56 = arith.andi %53, %55 : vector<26x8xi1>
    %cst_30 = arith.constant 0.000000e+00 : f32
    %57 = vector.broadcast %cst_30 : f32 to vector<26x8xf32>
    %58 = arith.select %56, %50, %57 : vector<26x8xi1>, vector<26x8xf32>
    %59 = vector.extract_strided_slice %58 {offsets = [0, 0], sizes = [24, 8], strides = [1, 1]} : vector<26x8xf32> to vector<24x8xf32>
    %60 = vector.extract_strided_slice %58 {offsets = [1, 0], sizes = [24, 8], strides = [1, 1]} : vector<26x8xf32> to vector<24x8xf32>
    %61 = vector.extract_strided_slice %58 {offsets = [2, 0], sizes = [24, 8], strides = [1, 1]} : vector<26x8xf32> to vector<24x8xf32>
    %62 = tpu.concatenate %59, %60, %61 in 1 : vector<24x8xf32>, vector<24x8xf32>, vector<24x8xf32> -> vector<24x24xf32>
    %cst_31 = arith.constant dense<0.000000e+00> : vector<24x8xf32>
    %63 = tpu.matmul %62, %3, %cst_31 {dimension_numbers = #tpu.dot_dimension_numbers<[1], [0], [0], [1], [0, 0, 1, 1], [], []>} : vector<24x24xf32>, vector<24x8xf32>, vector<24x8xf32> -> vector<24x8xf32>
    %64 = vector.broadcast %11 : vector<1x8xf32> to vector<24x8xf32>
    %65 = arith.addf %63, %64 : vector<24x8xf32>
    %cst_32 = arith.constant 0.000000e+00 : f32
    %66 = vector.broadcast %cst_32 : f32 to vector<24x8xf32>
    %67 = arith.maximumf %65, %66 : vector<24x8xf32>
    %68 = tpu.iota {dimensions = array<i32: 0>} : vector<24x8xi32>
    %c4_i32 = arith.constant 4 : i32
    %69 = vector.broadcast %c4_i32 : i32 to vector<24x8xi32>
    %70 = arith.cmpi sge, %68, %69 : vector<24x8xi32>
    %c20_i32 = arith.constant 20 : i32
    %71 = vector.broadcast %c20_i32 : i32 to vector<24x8xi32>
    %72 = arith.cmpi slt, %68, %71 : vector<24x8xi32>
    %73 = arith.andi %70, %72 : vector<24x8xi1>
    %cst_33 = arith.constant 0.000000e+00 : f32
    %74 = vector.broadcast %cst_33 : f32 to vector<24x8xf32>
    %75 = arith.select %73, %67, %74 : vector<24x8xi1>, vector<24x8xf32>
    %76 = vector.extract_strided_slice %75 {offsets = [0, 0], sizes = [20, 8], strides = [1, 1]} : vector<24x8xf32> to vector<20x8xf32>
    %77 = vector.extract_strided_slice %75 {offsets = [2, 0], sizes = [20, 8], strides = [1, 1]} : vector<24x8xf32> to vector<20x8xf32>
    %78 = vector.extract_strided_slice %75 {offsets = [4, 0], sizes = [20, 8], strides = [1, 1]} : vector<24x8xf32> to vector<20x8xf32>
    %79 = tpu.concatenate %76, %77, %78 in 1 : vector<20x8xf32>, vector<20x8xf32>, vector<20x8xf32> -> vector<20x24xf32>
    %cst_34 = arith.constant dense<0.000000e+00> : vector<20x8xf32>
    %80 = tpu.matmul %79, %5, %cst_34 {dimension_numbers = #tpu.dot_dimension_numbers<[1], [0], [0], [1], [0, 0, 1, 1], [], []>} : vector<20x24xf32>, vector<24x8xf32>, vector<20x8xf32> -> vector<20x8xf32>
    %81 = vector.broadcast %13 : vector<1x8xf32> to vector<20x8xf32>
    %82 = arith.addf %80, %81 : vector<20x8xf32>
    %cst_35 = arith.constant 0.000000e+00 : f32
    %83 = vector.broadcast %cst_35 : f32 to vector<20x8xf32>
    %84 = arith.maximumf %82, %83 : vector<20x8xf32>
    %85 = tpu.iota {dimensions = array<i32: 0>} : vector<20x8xi32>
    %c2_i32 = arith.constant 2 : i32
    %86 = vector.broadcast %c2_i32 : i32 to vector<20x8xi32>
    %87 = arith.cmpi sge, %85, %86 : vector<20x8xi32>
    %c18_i32 = arith.constant 18 : i32
    %88 = vector.broadcast %c18_i32 : i32 to vector<20x8xi32>
    %89 = arith.cmpi slt, %85, %88 : vector<20x8xi32>
    %90 = arith.andi %87, %89 : vector<20x8xi1>
    %cst_36 = arith.constant 0.000000e+00 : f32
    %91 = vector.broadcast %cst_36 : f32 to vector<20x8xf32>
    %92 = arith.select %90, %84, %91 : vector<20x8xi1>, vector<20x8xf32>
    %93 = vector.extract_strided_slice %92 {offsets = [0, 0], sizes = [16, 8], strides = [1, 1]} : vector<20x8xf32> to vector<16x8xf32>
    %94 = vector.extract_strided_slice %92 {offsets = [2, 0], sizes = [16, 8], strides = [1, 1]} : vector<20x8xf32> to vector<16x8xf32>
    %95 = vector.extract_strided_slice %92 {offsets = [4, 0], sizes = [16, 8], strides = [1, 1]} : vector<20x8xf32> to vector<16x8xf32>
    %96 = tpu.concatenate %93, %94, %95 in 1 : vector<16x8xf32>, vector<16x8xf32>, vector<16x8xf32> -> vector<16x24xf32>
    %cst_37 = arith.constant dense<0.000000e+00> : vector<16x8xf32>
    %97 = tpu.matmul %96, %7, %cst_37 {dimension_numbers = #tpu.dot_dimension_numbers<[1], [0], [0], [1], [0, 0, 1, 1], [], []>} : vector<16x24xf32>, vector<24x8xf32>, vector<16x8xf32> -> vector<16x8xf32>
    %98 = vector.broadcast %15 : vector<1x8xf32> to vector<16x8xf32>
    %99 = arith.addf %97, %98 : vector<16x8xf32>
    %cst_38 = arith.constant 0.000000e+00 : f32
    %100 = vector.broadcast %cst_38 : f32 to vector<16x8xf32>
    %101 = arith.maximumf %99, %100 : vector<16x8xf32>
    %c0_39 = arith.constant 0 : index
    %c0_40 = arith.constant 0 : index
    %c0_41 = arith.constant 0 : index
    %102 = vector.load %arg4[%c0_39, %c0_40, %c0_41] : memref<2x16x8xf32, #tpu.memory_space<vmem>>, vector<1x16x8xf32>
    %103 = vector.shape_cast %102 : vector<1x16x8xf32> to vector<16x8xf32>
    %104 = vector.shape_cast %101 : vector<16x8xf32> to vector<1x16x8xf32>
    tpu.vector_store %arg4[%c0_39, %c0_40, %c0_41], %104 {strides = array<i32>} : memref<2x16x8xf32, #tpu.memory_space<vmem>>, vector<1x16x8xf32>,
    %c1_42 = arith.constant 1 : index
    %c0_43 = arith.constant 0 : index
    %c0_44 = arith.constant 0 : index
    %105 = vector.load %arg1[%c1_42, %c0_43, %c0_44] : memref<2x28x8xf32, #tpu.memory_space<vmem>>, vector<1x28x8xf32>
    %106 = vector.shape_cast %105 : vector<1x28x8xf32> to vector<28x8xf32>
    %107 = tpu.iota {dimensions = array<i32: 0>} : vector<28x8xi32>
    %c6_i32_45 = arith.constant 6 : i32
    %108 = vector.broadcast %c6_i32_45 : i32 to vector<28x8xi32>
    %109 = arith.cmpi sge, %107, %108 : vector<28x8xi32>
    %c22_i32_46 = arith.constant 22 : i32
    %110 = vector.broadcast %c22_i32_46 : i32 to vector<28x8xi32>
    %111 = arith.cmpi slt, %107, %110 : vector<28x8xi32>
    %112 = arith.andi %109, %111 : vector<28x8xi1>
    %cst_47 = arith.constant dense<0.000000e+00> : vector<8xf32>
    %113 = vector.multi_reduction <add>, %106, %cst_47 [0] : vector<28x8xf32> to vector<8xf32>
    %114 = vector.shape_cast %113 : vector<8xf32> to vector<1x8xf32>
    %cst_48 = arith.constant 6.250000e-02 : f32
    %115 = vector.broadcast %cst_48 : f32 to vector<1x8xf32>
    %116 = arith.mulf %114, %115 : vector<1x8xf32>
    %117 = vector.broadcast %116 : vector<1x8xf32> to vector<28x8xf32>
    %118 = arith.subf %106, %117 : vector<28x8xf32>
    %cst_49 = arith.constant 0.000000e+00 : f32
    %119 = vector.broadcast %cst_49 : f32 to vector<28x8xf32>
    %120 = arith.select %112, %118, %119 : vector<28x8xi1>, vector<28x8xf32>
    %121 = arith.mulf %120, %120 : vector<28x8xf32>
    %cst_50 = arith.constant dense<0.000000e+00> : vector<8xf32>
    %122 = vector.multi_reduction <add>, %121, %cst_50 [0] : vector<28x8xf32> to vector<8xf32>
    %123 = vector.shape_cast %122 : vector<8xf32> to vector<1x8xf32>
    %cst_51 = arith.constant 6.250000e-02 : f32
    %124 = vector.broadcast %cst_51 : f32 to vector<1x8xf32>
    %125 = arith.mulf %123, %124 : vector<1x8xf32>
    %cst_52 = arith.constant 9.99999974E-6 : f32
    %126 = vector.broadcast %cst_52 : f32 to vector<1x8xf32>
    %127 = arith.addf %125, %126 : vector<1x8xf32>
    %128 = math.rsqrt %127 : vector<1x8xf32>
    %129 = vector.broadcast %128 : vector<1x8xf32> to vector<28x8xf32>
    %130 = arith.mulf %120, %129 : vector<28x8xf32>
    %131 = vector.extract_strided_slice %130 {offsets = [0, 0], sizes = [26, 8], strides = [1, 1]} : vector<28x8xf32> to vector<26x8xf32>
    %132 = vector.extract_strided_slice %130 {offsets = [1, 0], sizes = [26, 8], strides = [1, 1]} : vector<28x8xf32> to vector<26x8xf32>
    %133 = vector.extract_strided_slice %130 {offsets = [2, 0], sizes = [26, 8], strides = [1, 1]} : vector<28x8xf32> to vector<26x8xf32>
    %134 = tpu.concatenate %131, %132, %133 in 1 : vector<26x8xf32>, vector<26x8xf32>, vector<26x8xf32> -> vector<26x24xf32>
    %cst_53 = arith.constant dense<0.000000e+00> : vector<26x8xf32>
    %135 = tpu.matmul %134, %1, %cst_53 {dimension_numbers = #tpu.dot_dimension_numbers<[1], [0], [0], [1], [0, 0, 1, 1], [], []>} : vector<26x24xf32>, vector<24x8xf32>, vector<26x8xf32> -> vector<26x8xf32>
    %136 = vector.broadcast %9 : vector<1x8xf32> to vector<26x8xf32>
    %137 = arith.addf %135, %136 : vector<26x8xf32>
    %cst_54 = arith.constant 0.000000e+00 : f32
    %138 = vector.broadcast %cst_54 : f32 to vector<26x8xf32>
    %139 = arith.maximumf %137, %138 : vector<26x8xf32>
    %140 = tpu.iota {dimensions = array<i32: 0>} : vector<26x8xi32>
    %c5_i32_55 = arith.constant 5 : i32
    %141 = vector.broadcast %c5_i32_55 : i32 to vector<26x8xi32>
    %142 = arith.cmpi sge, %140, %141 : vector<26x8xi32>
    %c21_i32_56 = arith.constant 21 : i32
    %143 = vector.broadcast %c21_i32_56 : i32 to vector<26x8xi32>
    %144 = arith.cmpi slt, %140, %143 : vector<26x8xi32>
    %145 = arith.andi %142, %144 : vector<26x8xi1>
    %cst_57 = arith.constant 0.000000e+00 : f32
    %146 = vector.broadcast %cst_57 : f32 to vector<26x8xf32>
    %147 = arith.select %145, %139, %146 : vector<26x8xi1>, vector<26x8xf32>
    %148 = vector.extract_strided_slice %147 {offsets = [0, 0], sizes = [24, 8], strides = [1, 1]} : vector<26x8xf32> to vector<24x8xf32>
    %149 = vector.extract_strided_slice %147 {offsets = [1, 0], sizes = [24, 8], strides = [1, 1]} : vector<26x8xf32> to vector<24x8xf32>
    %150 = vector.extract_strided_slice %147 {offsets = [2, 0], sizes = [24, 8], strides = [1, 1]} : vector<26x8xf32> to vector<24x8xf32>
    %151 = tpu.concatenate %148, %149, %150 in 1 : vector<24x8xf32>, vector<24x8xf32>, vector<24x8xf32> -> vector<24x24xf32>
    %cst_58 = arith.constant dense<0.000000e+00> : vector<24x8xf32>
    %152 = tpu.matmul %151, %3, %cst_58 {dimension_numbers = #tpu.dot_dimension_numbers<[1], [0], [0], [1], [0, 0, 1, 1], [], []>} : vector<24x24xf32>, vector<24x8xf32>, vector<24x8xf32> -> vector<24x8xf32>
    %153 = vector.broadcast %11 : vector<1x8xf32> to vector<24x8xf32>
    %154 = arith.addf %152, %153 : vector<24x8xf32>
    %cst_59 = arith.constant 0.000000e+00 : f32
    %155 = vector.broadcast %cst_59 : f32 to vector<24x8xf32>
    %156 = arith.maximumf %154, %155 : vector<24x8xf32>
    %157 = tpu.iota {dimensions = array<i32: 0>} : vector<24x8xi32>
    %c4_i32_60 = arith.constant 4 : i32
    %158 = vector.broadcast %c4_i32_60 : i32 to vector<24x8xi32>
    %159 = arith.cmpi sge, %157, %158 : vector<24x8xi32>
    %c20_i32_61 = arith.constant 20 : i32
    %160 = vector.broadcast %c20_i32_61 : i32 to vector<24x8xi32>
    %161 = arith.cmpi slt, %157, %160 : vector<24x8xi32>
    %162 = arith.andi %159, %161 : vector<24x8xi1>
    %cst_62 = arith.constant 0.000000e+00 : f32
    %163 = vector.broadcast %cst_62 : f32 to vector<24x8xf32>
    %164 = arith.select %162, %156, %163 : vector<24x8xi1>, vector<24x8xf32>
    %165 = vector.extract_strided_slice %164 {offsets = [0, 0], sizes = [20, 8], strides = [1, 1]} : vector<24x8xf32> to vector<20x8xf32>
    %166 = vector.extract_strided_slice %164 {offsets = [2, 0], sizes = [20, 8], strides = [1, 1]} : vector<24x8xf32> to vector<20x8xf32>
    %167 = vector.extract_strided_slice %164 {offsets = [4, 0], sizes = [20, 8], strides = [1, 1]} : vector<24x8xf32> to vector<20x8xf32>
    %168 = tpu.concatenate %165, %166, %167 in 1 : vector<20x8xf32>, vector<20x8xf32>, vector<20x8xf32> -> vector<20x24xf32>
    %cst_63 = arith.constant dense<0.000000e+00> : vector<20x8xf32>
    %169 = tpu.matmul %168, %5, %cst_63 {dimension_numbers = #tpu.dot_dimension_numbers<[1], [0], [0], [1], [0, 0, 1, 1], [], []>} : vector<20x24xf32>, vector<24x8xf32>, vector<20x8xf32> -> vector<20x8xf32>
    %170 = vector.broadcast %13 : vector<1x8xf32> to vector<20x8xf32>
    %171 = arith.addf %169, %170 : vector<20x8xf32>
    %cst_64 = arith.constant 0.000000e+00 : f32
    %172 = vector.broadcast %cst_64 : f32 to vector<20x8xf32>
    %173 = arith.maximumf %171, %172 : vector<20x8xf32>
    %174 = tpu.iota {dimensions = array<i32: 0>} : vector<20x8xi32>
    %c2_i32_65 = arith.constant 2 : i32
    %175 = vector.broadcast %c2_i32_65 : i32 to vector<20x8xi32>
    %176 = arith.cmpi sge, %174, %175 : vector<20x8xi32>
    %c18_i32_66 = arith.constant 18 : i32
    %177 = vector.broadcast %c18_i32_66 : i32 to vector<20x8xi32>
    %178 = arith.cmpi slt, %174, %177 : vector<20x8xi32>
    %179 = arith.andi %176, %178 : vector<20x8xi1>
    %cst_67 = arith.constant 0.000000e+00 : f32
    %180 = vector.broadcast %cst_67 : f32 to vector<20x8xf32>
    %181 = arith.select %179, %173, %180 : vector<20x8xi1>, vector<20x8xf32>
    %182 = vector.extract_strided_slice %181 {offsets = [0, 0], sizes = [16, 8], strides = [1, 1]} : vector<20x8xf32> to vector<16x8xf32>
    %183 = vector.extract_strided_slice %181 {offsets = [2, 0], sizes = [16, 8], strides = [1, 1]} : vector<20x8xf32> to vector<16x8xf32>
    %184 = vector.extract_strided_slice %181 {offsets = [4, 0], sizes = [16, 8], strides = [1, 1]} : vector<20x8xf32> to vector<16x8xf32>
    %185 = tpu.concatenate %182, %183, %184 in 1 : vector<16x8xf32>, vector<16x8xf32>, vector<16x8xf32> -> vector<16x24xf32>
    %cst_68 = arith.constant dense<0.000000e+00> : vector<16x8xf32>
    %186 = tpu.matmul %185, %7, %cst_68 {dimension_numbers = #tpu.dot_dimension_numbers<[1], [0], [0], [1], [0, 0, 1, 1], [], []>} : vector<16x24xf32>, vector<24x8xf32>, vector<16x8xf32> -> vector<16x8xf32>
    %187 = vector.broadcast %15 : vector<1x8xf32> to vector<16x8xf32>
    %188 = arith.addf %186, %187 : vector<16x8xf32>
    %cst_69 = arith.constant 0.000000e+00 : f32
    %189 = vector.broadcast %cst_69 : f32 to vector<16x8xf32>
    %190 = arith.maximumf %188, %189 : vector<16x8xf32>
    %c1_70 = arith.constant 1 : index
    %c0_71 = arith.constant 0 : index
    %c0_72 = arith.constant 0 : index
    %191 = vector.load %arg4[%c1_70, %c0_71, %c0_72] : memref<2x16x8xf32, #tpu.memory_space<vmem>>, vector<1x16x8xf32>
    %192 = vector.shape_cast %191 : vector<1x16x8xf32> to vector<16x8xf32>
    %193 = vector.shape_cast %190 : vector<16x8xf32> to vector<1x16x8xf32>
    tpu.vector_store %arg4[%c1_70, %c0_71, %c0_72], %193 {strides = array<i32>} : memref<2x16x8xf32, #tpu.memory_space<vmem>>, vector<1x16x8xf32>,
    return
  }
  func.func @transform_0(%arg0: i32) -> (i32, i32, i32) {
    %c0_i32 = arith.constant 0 : i32
    %c0_i32_0 = arith.constant 0 : i32
    %c0_i32_1 = arith.constant 0 : i32
    return %arg0, %c0_i32, %c0_i32_0 : i32, i32, i32
  }
  func.func @transform_1(%arg0: i32) -> (i32, i32, i32) {
    %c0_i32 = arith.constant 0 : i32
    %c0_i32_0 = arith.constant 0 : i32
    %c0_i32_1 = arith.constant 0 : i32
    %c0_i32_2 = arith.constant 0 : i32
    return %c0_i32, %c0_i32_0, %c0_i32_1 : i32, i32, i32
  }
  func.func @transform_2(%arg0: i32) -> (i32, i32, i32) {
    %c0_i32 = arith.constant 0 : i32
    %c0_i32_0 = arith.constant 0 : i32
    %c0_i32_1 = arith.constant 0 : i32
    %c0_i32_2 = arith.constant 0 : i32
    return %c0_i32, %c0_i32_0, %c0_i32_1 : i32, i32, i32
  }
  func.func @transform_3(%arg0: i32) -> (i32, i32, i32) {
    %c0_i32 = arith.constant 0 : i32
    %c0_i32_0 = arith.constant 0 : i32
    %c0_i32_1 = arith.constant 0 : i32
    return %arg0, %c0_i32, %c0_i32_0 : i32, i32, i32
  }
}

</mosaic_0001>

<bundles_post_ra>
// kernel: model_forward.1
= control target key start
LH: loop header
LB: loop body
LE: loop exit
PB: predicated region body
PF: predicated region fallthrough
CT: control target
= control target key end

     0   :  { %vm57_vm0 = vcmask 64512   ;;  %vm63_vm1 = vcmask 60416   ;;  %v40_v12 = vlaneseq  ;;  %vm118_vm7 = vcmask 1046528   ;;  %s923_s20 = smov 8   ;;  %s924_s21 = smov 16   ;;  %s1344_s0 = inlined_call_operand.vmem [shape: f32[2,28,8], index: 0, kind: input, shape index: {}]   ;;  %s1345_s2 = inlined_call_operand.vmem [shape: f32[4,1,8], index: 2, kind: input, shape index: {}]   ;;  %s1346_s1 = inlined_call_operand.vmem [shape: f32[4,24,8], index: 1, kind: input, shape index: {}]   ;;  %s1347_s3 = inlined_call_operand.vmem [shape: f32[2,16,8], index: 3, kind: output, shape index: {}]  }
   0x1   :  { %v36_v0 = vld [vmem:[%s1344_s0] sm:$0xff]  ;;  %v37_v1 = vld [vmem:[%s1344_s0 + $0x8] sm:$0xff]  ;;  %v38_v2 = vld [vmem:[%s1344_s0 + $0x10] sm:$0xff]  ;;  %vm138_vm8 = vcmask 1045504   ;;  %vm162_vm9 = vcmask 130048   ;;  %vm170_vm10 = vcmask 195584  }
   0x2   :  { %v39_v3 = vld [vmem:[%s1344_s0 + $0x18] sm:$0xf]  ;;  %v58_v4 = vsel %vm57_vm0, %v36_v0, 0.0  ;;  %v59_v5 = vsel %vm57_vm0, %v37_v1, 0.0  ;;  %v61_v6 = vsel %vm57_vm0, %v38_v2, 0.0  ;;  %v962_v15 = vshrl.u32 %v40_v12, 7 }
   0x3   :  { %v60_v7 = vadd.f32 %v59_v5, %v58_v4  ;;  %v64_v8 = vsel %vm63_vm1, %v39_v3, 0.0  ;;  %v999_v3 = vld [vmem:[%s1346_s1 + $0x10] sm:$0xff]  ;;  %v1004_v4 = vld [vmem:[%s1346_s1 + $0x8] sm:$0xff]  ;;  %v1011_v5 = vld [vmem:[%s1346_s1] sm:$0xff]  ;;  %vm344_vm14 = vcmask 1043456  }
   0x4   :  { %v965_v18 = vadd.s32 16, %v962_v15  ;;  %vm45_vm2 = vcmp.ge.s32.totalorder %v962_v15, 6  ;;  %196 = vmatpush.msra.mxu0 %v999_v3  ;;  %vm216_vm11 = vcmp.ge.s32.totalorder %v962_v15, 5  ;;  %vm315_vm13 = vcmp.ge.s32.totalorder %v962_v15, 4 }
   0x5   :  { %v62_v9 = vadd.f32 %v61_v6, %v60_v7 }
   0x6   :  { %vm51_vm3 = vcmp.lt.s32.totalorder %v965_v18, 22  ;;  %197 = vmatpush.msra.mxu0 %v1004_v4  ;;  %vm222_vm12 = vcmp.lt.s32.totalorder %v965_v18, 21  ;;  %vm320_vm15 = vcmp.lt.s32.totalorder %v965_v18, 20 }
   0x7   :  { %v65_v10 = vadd.f32 %v64_v8, %v62_v9 }
   0x8   :  { %198 = vmatpush.msra.mxu0 %v1011_v5 }
   0x9   :  { %v66_v11 = vrot.slane %v65_v10, 4 }
   0xb   :  { %v67_v13 = vadd.f32 %v66_v11, %v65_v10 }
   0xd   :  { %v68_v14 = vrot.slane %v67_v13, 2 }
   0xf   :  { %v69_v16 = vadd.f32 %v68_v14, %v67_v13 }
  0x11   :  { %v70_v17 = vrot.slane %v69_v16, 1 }
  0x13   :  { %v71_v19 = vadd.f32 %v70_v17, %v69_v16 }
  0x15   :  { %v72_v20 = vmul.f32 0.0625, %v71_v19 }
  0x17   :  { %v73_v21 = vsub.f32 %v36_v0, %v72_v20  ;;  %v74_v22 = vsub.f32 %v37_v1, %v72_v20  ;;  %v75_v23 = vsub.f32 %v38_v2, %v72_v20  ;;  %v1026_v20 = vld [vmem:[%s1345_s2] ss:$0 sm:$0xff] }
  0x19   :  { %v77_v24 = vsel %vm45_vm2, %v73_v21, 0.0  ;;  %v79_v25 = vsel %vm51_vm3, %v75_v23, 0.0  ;;  %v82_v26 = vmul.f32 %v74_v22, %v74_v22 }
  0x1a   :  { %v81_v27 = vmul.f32 %v77_v24, %v77_v24  ;;  %v83_v28 = vmul.f32 %v79_v25, %v79_v25 }
  0x1b   :  { %v86_v29 = vsel %vm57_vm0, %v82_v26, 0.0 }
  0x1c   :  { %v85_v30 = vsel %vm57_vm0, %v81_v27, 0.0  ;;  %v88_v31 = vsel %vm57_vm0, %v83_v28, 0.0 }
  0x1d   :  { %v87_v32 = vadd.f32 %v86_v29, %v85_v30 }
  0x1f   :  { %v89_v33 = vadd.f32 %v88_v31, %v87_v32 }
  0x21   :  { %v92_v34 = vrot.slane %v89_v33, 4 }
  0x23   :  { %v93_v35 = vadd.f32 %v92_v34, %v89_v33 }
  0x25   :  { %v94_v36 = vrot.slane %v93_v35, 2 }
  0x27   :  { %v95_v37 = vadd.f32 %v94_v36, %v93_v35 }
  0x29   :  { %v96_v38 = vrot.slane %v95_v37, 1 }
  0x2b   :  { %v97_v39 = vadd.f32 %v96_v38, %v95_v37  ;;  %v925_v37 = vmov 0.0  }
  0x2c   :  { %v1039_v38 = vrot.slane %v925_v37, 1 }
  0x2d   :  { %v98_v40 = vmul.f32 0.0625, %v97_v39 }
  0x2f   :  { %v99_v41 = vadd.f32 1e-05, %v98_v40 }
  0x31   :  { %919 = vrsqrt.f32 %v99_v41  ;;  %vm106_vm4 = vweird.f32 %v99_v41 }
  0x37   :  { %v920_v42 = vpop.eup %919 }
  0x38   :  { %v101_v43 = vmul.f32 %v920_v42, %v99_v41  ;;  %vm107_vm5 = vweird.f32 %v920_v42 }
  0x39   :  { %vm108_vm6 = vmor %vm106_vm4, %vm107_vm5  ;;  %vm406_vm4 = vcmp.ge.s32.totalorder %v962_v15, 2  ;;  %vm411_vm5 = vcmp.lt.s32.totalorder %v965_v18, 18 }
  0x3a   :  { %v102_v44 = vmul.f32 %v920_v42, %v101_v43 }
  0x3c   :  { %v103_v45 = vmul.f32 0.5, %v102_v44 }
  0x3e   :  { %v104_v46 = vsub.f32 1.5, %v103_v45  ;;  %v1050_v45 = vrot.slane %v925_v37, 2 }
  0x40   :  { %v105_v47 = vmul.f32 %v920_v42, %v104_v46 }
  0x42   :  { %v109_v48 = vsel %vm108_vm6, %v920_v42, %v105_v47  ;;  %v872_v47 = vld [vmem:[%s1346_s1 + $0x28] sm:$0xff] }
  0x43   :  { %v110_v49 = vmul.f32 %v109_v48, %v77_v24  ;;  %v111_v50 = vmul.f32 %v109_v48, %v74_v22  ;;  %v112_v51 = vmul.f32 %v109_v48, %v79_v25  ;;  %v976_v52 = vmul.f32 0.0, %v109_v48  ;;  %v871_v48 = vld [vmem:[%s1346_s1 + $0x20] sm:$0xff]  ;;  %299 = vmatpush.msra.mxu1 %v872_v47 }
  0x45   :  { %v119_v53 = vrot.slane %v110_v49, 1  ;;  %v120_v54 = vrot.slane %v111_v50, 1  ;;  %v122_v55 = vrot.slane %v112_v51, 1  ;;  %v124_v56 = vrot.slane %v976_v52, 1  ;;  %300 = vmatpush.msra.mxu1 %v871_v48 }
  0x46   :  { %v139_v60 = vrot.slane %v110_v49, 2  ;;  %v140_v61 = vrot.slane %v111_v50, 2  ;;  %v142_v62 = vrot.slane %v112_v51, 2  ;;  %v144_v63 = vrot.slane %v976_v52, 2 }
  0x47   :  { %v121_v57 = vsel %vm118_vm7, %v119_v53, %v120_v54  ;;  %v123_v58 = vsel %vm118_vm7, %v120_v54, %v122_v55  ;;  %v125_v59 = vsel %vm118_vm7, %v122_v55, %v124_v56 }
  0x48   :  { %126 = vrot.lane.b32.xlu0 %v121_v57, %s923_s20  ;;  %128 = vrot.lane.b32.xlu1 %v123_v58, %s923_s20  ;;  %v141_v0 = vsel %vm138_vm8, %v139_v60, %v140_v61  ;;  %v143_v1 = vsel %vm138_vm8, %v140_v61, %v142_v62  ;;  %v145_v2 = vsel %vm138_vm8, %v142_v62, %v144_v63 }
  0x49   :  { %130 = vrot.lane.b32.xlu2 %v125_v59, %s923_s20 }
  0x50   :  { %146 = vrot.lane.b32.xlu0 %v141_v0, %s924_s21  ;;  %148 = vrot.lane.b32.xlu1 %v143_v1, %s924_s21  ;;  %v1076_v1 = vld [vmem:[%s1345_s2 + $0x1] ss:$0 sm:$0xff] }
  0x51   :  { %150 = vrot.lane.b32.xlu2 %v145_v2, %s924_s21 }
  0xa3   :  { %v131_v11 = vpop.permute.xlu2 %130 }
  0xa4   :  { %v160_v16 = vsel %vm57_vm0, %v112_v51, %v131_v11 }
  0xab   :  { %v151_v17 = vpop.permute.xlu2 %150 }
  0xac   :  { %v165_v19 = vsel %vm162_vm9, %v160_v16, %v151_v17 }
  0xba   :  { %v127_v6 = vpop.permute.xlu0 %126  ;;  %v129_v7 = vpop.permute.xlu1 %128 }
  0xbb   :  { %v158_v8 = vsel %vm57_vm0, %v110_v49, %v127_v6  ;;  %v159_v12 = vsel %vm57_vm0, %v111_v50, %v129_v7  ;;  %v870_v49 = vld [vmem:[%s1346_s1 + $0x18] sm:$0xff] }
  0xbc   :  { %301 = vmatpush.msra.mxu1 %v870_v49 }
  0xbe   :  { %706 = vmatpush.msrb.mxu1 %v872_v47  ;;  %v895_v47 = vld [vmem:[%s1344_s0 + $0x28] sm:$0xff] }
  0xc0   :  { %707 = vmatpush.msrb.mxu1 %v871_v48 }
  0xc2   :  { %v147_v9 = vpop.permute.xlu0 %146  ;;  %v149_v13 = vpop.permute.xlu1 %148  ;;  %708 = vmatpush.msrb.mxu1 %v870_v49  ;;  %v489_v49 = vsel %vm57_vm0, %v895_v47, 0.0 }
  0xc3   :  { %v163_v10 = vsel %vm162_vm9, %v158_v8, %v147_v9  ;;  %v164_v14 = vsel %vm162_vm9, %v159_v12, %v149_v13 }
  0xc4   :  { %882 = vmatmul.msk.f32.vlgmr.msra.gmra.mxu0 %vm170_vm10, %v163_v10 }
  0xcc   :  { %883 = vmatmul.msk.f32.gmra.mxu0 %vm170_vm10, %v164_v14 }
  0xd4   :  { %884 = vmatmul.msk.f32.gmra.mxu0 %vm170_vm10, %v165_v19 }
 0x141   :  { %v200_v21 = vpop.f32.mrf.mxu0 }
 0x142   :  { %v201_v22 = vadd.f32 %v1026_v20, %v200_v21 }
 0x144   :  { %v212_v23 = vmax.f32 %v201_v22, 0.0 }
 0x146   :  { %v228_v26 = vsel %vm216_vm11, %v212_v23, 0.0 }
 0x147   :  { %v236_v28 = vrot.slane %v228_v26, 1  ;;  %v252_v29 = vrot.slane %v228_v26, 2 }
 0x149   :  { %v203_v24 = vpop.f32.mrf.mxu0 }
 0x14a   :  { %v204_v25 = vadd.f32 %v1026_v20, %v203_v24 }
 0x14c   :  { %v213_v27 = vmax.f32 %v204_v25, 0.0 }
 0x14e   :  { %v237_v30 = vrot.slane %v213_v27, 1  ;;  %v253_v31 = vrot.slane %v213_v27, 2 }
 0x150   :  { %v254_v32 = vsel %vm138_vm8, %v252_v29, %v253_v31  ;;  %v238_v33 = vsel %vm118_vm7, %v236_v28, %v237_v30  ;;  %v875_v29 = vld [vmem:[%s1346_s1 + $0x40] sm:$0xff] }
 0x151   :  { %v206_v34 = vpop.f32.mrf.mxu0  ;;  %259 = vrot.lane.b32.xlu1 %v254_v32, %s924_s21  ;;  %243 = vrot.lane.b32.xlu0 %v238_v33, %s923_s20 }
 0x152   :  { %v207_v35 = vadd.f32 %v1026_v20, %v206_v34  ;;  %390 = vmatpush.msra.mxu2 %v875_v29 }
 0x154   :  { %v214_v36 = vmax.f32 %v207_v35, 0.0 }
 0x156   :  { %v230_v39 = vsel %vm222_vm12, %v214_v36, 0.0 }
 0x157   :  { %v239_v40 = vrot.slane %v230_v39, 1  ;;  %v255_v41 = vrot.slane %v230_v39, 2 }
 0x159   :  { %v240_v42 = vsel %vm118_vm7, %v237_v30, %v239_v40  ;;  %v242_v43 = vsel %vm118_vm7, %v239_v40, %v1039_v38  ;;  %v256_v44 = vsel %vm138_vm8, %v253_v31, %v255_v41  ;;  %v258_v46 = vsel %vm138_vm8, %v255_v41, %v1050_v45  ;;  %v874_v30 = vld [vmem:[%s1346_s1 + $0x38] sm:$0xff]  ;;  %v873_v31 = vld [vmem:[%s1346_s1 + $0x30] sm:$0xff] }
 0x15a   :  { %245 = vrot.lane.b32.xlu2 %v240_v42, %s923_s20  ;;  %247 = vrot.lane.b32.xlu1 %v242_v43, %s923_s20 }
 0x15b   :  { %261 = vrot.lane.b32.xlu0 %v256_v44, %s924_s21  ;;  %391 = vmatpush.msra.mxu2 %v874_v30 }
 0x15d   :  { %392 = vmatpush.msra.mxu2 %v873_v31 }
 0x15f   :  { %784 = vmatpush.msrb.mxu2 %v875_v29 }
 0x161   :  { %785 = vmatpush.msrb.mxu2 %v874_v30 }
 0x162   :  { %263 = vrot.lane.b32.xlu2 %v258_v46, %s924_s21  ;;  %v894_v46 = vld [vmem:[%s1344_s0 + $0x20] sm:$0xff] }
 0x163   :  { %786 = vmatpush.msrb.mxu2 %v873_v31  ;;  %v488_v48 = vsel %vm57_vm0, %v894_v46, 0.0 }
 0x1b4   :  { %v246_v55 = vpop.permute.xlu2 %245 }
 0x1b5   :  { %v269_v57 = vsel %vm57_vm0, %v213_v27, %v246_v55 }
 0x1bc   :  { %v264_v62 = vpop.permute.xlu2 %263 }
 0x1c3   :  { %v260_v50 = vpop.permute.xlu1 %259  ;;  %v244_v51 = vpop.permute.xlu0 %243 }
 0x1c4   :  { %v268_v53 = vsel %vm57_vm0, %v228_v26, %v244_v51  ;;  %v490_v51 = vadd.f32 %v489_v49, %v488_v48 }
 0x1c5   :  { %v271_v54 = vsel %vm162_vm9, %v268_v53, %v260_v50  ;;  %v896_v50 = vld [vmem:[%s1344_s0 + $0x30] sm:$0xff] }
 0x1c6   :  { %886 = vmatmul.msk.f32.vlgmr.msra.gmra.mxu1 %vm170_vm10, %v271_v54  ;;  %v491_v53 = vsel %vm57_vm0, %v896_v50, 0.0  ;;  %v897_v54 = vld [vmem:[%s1344_s0 + $0x38] sm:$0xf] }
 0x1c7   :  { %v492_v55 = vadd.f32 %v491_v53, %v490_v51 }
 0x1cc   :  { %v248_v60 = vpop.permute.xlu1 %247 }
 0x1cd   :  { %v262_v58 = vpop.permute.xlu0 %261  ;;  %v270_v61 = vsel %vm57_vm0, %v230_v39, %v248_v60 }
 0x1ce   :  { %v272_v59 = vsel %vm162_vm9, %v269_v57, %v262_v58  ;;  %v273_v0 = vsel %vm162_vm9, %v270_v61, %v264_v62  ;;  %v493_v57 = vsel %vm63_vm1, %v897_v54, 0.0 }
 0x1cf   :  { %887 = vmatmul.msk.f32.gmra.mxu1 %vm170_vm10, %v272_v59  ;;  %v494_v58 = vadd.f32 %v493_v57, %v492_v55 }
 0x1d1   :  { %v495_v59 = vrot.slane %v494_v58, 4 }
 0x1d3   :  { %v496_v60 = vadd.f32 %v495_v59, %v494_v58 }
 0x1d5   :  { %v497_v61 = vrot.slane %v496_v60, 2 }
 0x1d7   :  { %888 = vmatmul.msk.f32.gmra.mxu1 %vm170_vm10, %v273_v0  ;;  %v498_v62 = vadd.f32 %v497_v61, %v496_v60 }
 0x1d9   :  { %v499_v0 = vrot.slane %v498_v62, 1 }
 0x243   :  { %v303_v2 = vpop.f32.mrf.mxu1 }
 0x244   :  { %v304_v6 = vadd.f32 %v1076_v1, %v303_v2  ;;  %v500_v2 = vadd.f32 %v499_v0, %v498_v62 }
 0x246   :  { %v312_v7 = vmax.f32 %v304_v6, 0.0  ;;  %v501_v6 = vmul.f32 0.0625, %v500_v2 }
 0x248   :  { %v324_v10 = vsel %vm315_vm13, %v312_v7, 0.0  ;;  %v502_v7 = vsub.f32 %v894_v46, %v501_v6 }
 0x249   :  { %v330_v12 = vrot.slane %v324_v10, 2  ;;  %v345_v13 = vrot.slane %v324_v10, 4 }
 0x24c   :  { %v306_v8 = vpop.f32.mrf.mxu1 }
 0x24d   :  { %v307_v9 = vadd.f32 %v1076_v1, %v306_v8  ;;  %v503_v8 = vsub.f32 %v895_v47, %v501_v6 }
 0x24f   :  { %v313_v11 = vmax.f32 %v307_v9, 0.0  ;;  %v504_v9 = vsub.f32 %v896_v50, %v501_v6 }
 0x251   :  { %v331_v14 = vrot.slane %v313_v11, 2  ;;  %v346_v16 = vrot.slane %v313_v11, 4 }
 0x253   :  { %v347_v17 = vsel %vm344_vm14, %v345_v13, %v346_v16  ;;  %v332_v19 = vsel %vm138_vm8, %v330_v12, %v331_v14  ;;  %v511_v12 = vmul.f32 %v503_v8, %v503_v8  ;;  %v508_v13 = vsel %vm51_vm3, %v504_v9, 0.0 }
 0x254   :  { %v309_v21 = vpop.f32.mrf.mxu1  ;;  %350 = vrot.lane.b32.xlu1 %v347_v17, %s924_s21  ;;  %335 = vrot.lane.b32.xlu0 %v332_v19, %s923_s20 }
 0x255   :  { %v310_v22 = vadd.f32 %v1076_v1, %v309_v21  ;;  %v515_v17 = vsel %vm57_vm0, %v511_v12, 0.0 }
 0x257   :  { %v314_v23 = vmax.f32 %v310_v22, 0.0 }
 0x259   :  { %v326_v24 = vsel %vm320_vm15, %v314_v23, 0.0 }
 0x25a   :  { %v348_v25 = vrot.slane %v326_v24, 4  ;;  %v333_v26 = vrot.slane %v326_v24, 2 }
 0x25c   :  { %339 = vrot.lane.b32.xlu1 %v333_v26, %s923_s20  ;;  %v334_v27 = vsel %vm138_vm8, %v331_v14, %v333_v26  ;;  %v349_v28 = vsel %vm344_vm14, %v346_v16, %v348_v25  ;;  %v512_v14 = vmul.f32 %v508_v13, %v508_v13 }
 0x25d   :  { %337 = vrot.lane.b32.xlu2 %v334_v27, %s923_s20  ;;  %352 = vrot.lane.b32.xlu0 %v349_v28, %s924_s21 }
 0x25e   :  { %v517_v21 = vsel %vm57_vm0, %v512_v14, 0.0 }
 0x265   :  { %354 = vrot.lane.b32.xlu2 %v348_v25, %s924_s21 }
 0x2b7   :  { %v338_v36 = vpop.permute.xlu2 %337 }
 0x2b8   :  { %v360_v37 = vsel %vm57_vm0, %v313_v11, %v338_v36 }
 0x2bf   :  { %v355_v43 = vpop.permute.xlu2 %354 }
 0x2c6   :  { %v351_v32 = vpop.permute.xlu1 %350  ;;  %v336_v33 = vpop.permute.xlu0 %335 }
 0x2c7   :  { %v359_v34 = vsel %vm57_vm0, %v324_v10, %v336_v33  ;;  %v506_v10 = vsel %vm45_vm2, %v502_v7, 0.0 }
 0x2c8   :  { %v362_v35 = vsel %vm162_vm9, %v359_v34, %v351_v32  ;;  %v510_v11 = vmul.f32 %v506_v10, %v506_v10 }
 0x2c9   :  { %889 = vmatmul.msk.f32.vlgmr.msra.gmra.mxu2 %vm170_vm10, %v362_v35  ;;  %v1141_v35 = vld [vmem:[%s1345_s2 + $0x2] ss:$0 sm:$0xff] }
 0x2ca   :  { %v514_v16 = vsel %vm57_vm0, %v510_v11, 0.0 }
 0x2cb   :  { %v516_v19 = vadd.f32 %v515_v17, %v514_v16 }
 0x2cd   :  { %v518_v22 = vadd.f32 %v517_v21, %v516_v19 }
 0x2ce   :  { %v340_v41 = vpop.permute.xlu1 %339 }
 0x2cf   :  { %v353_v39 = vpop.permute.xlu0 %352  ;;  %v361_v42 = vsel %vm57_vm0, %v326_v24, %v340_v41  ;;  %v521_v23 = vrot.slane %v518_v22, 4 }
 0x2d0   :  { %v363_v40 = vsel %vm162_vm9, %v360_v37, %v353_v39  ;;  %v364_v44 = vsel %vm162_vm9, %v361_v42, %v355_v43 }
 0x2d1   :  { %890 = vmatmul.msk.f32.gmra.mxu2 %vm170_vm10, %v363_v40  ;;  %v522_v24 = vadd.f32 %v521_v23, %v518_v22 }
 0x2d3   :  { %v523_v25 = vrot.slane %v522_v24, 2 }
 0x2d5   :  { %v524_v26 = vadd.f32 %v523_v25, %v522_v24 }
 0x2d7   :  { %v525_v27 = vrot.slane %v524_v26, 1 }
 0x2d9   :  { %891 = vmatmul.msk.f32.gmra.mxu2 %vm170_vm10, %v364_v44  ;;  %v526_v28 = vadd.f32 %v525_v27, %v524_v26  ;;  %v878_v26 = vld [vmem:[%s1346_s1 + $0x58] sm:$0xff]  ;;  %v877_v27 = vld [vmem:[%s1346_s1 + $0x50] sm:$0xff] }
 0x2da   :  { %469 = vmatpush.msra.mxu3 %v878_v26  ;;  %851 = vmatpush.msrb.mxu0 %v878_v26 }
 0x2db   :  { %v527_v29 = vmul.f32 0.0625, %v526_v28  ;;  %v876_v28 = vld [vmem:[%s1346_s1 + $0x48] sm:$0xff] }
 0x2dc   :  { %470 = vmatpush.msra.mxu3 %v877_v27  ;;  %852 = vmatpush.msrb.mxu0 %v877_v27 }
 0x2dd   :  { %v528_v30 = vadd.f32 1e-05, %v527_v29 }
 0x2de   :  { %471 = vmatpush.msra.mxu3 %v876_v28  ;;  %853 = vmatpush.msrb.mxu0 %v876_v28 }
 0x2df   :  { %921 = vrsqrt.f32 %v528_v30  ;;  %vm535_vm1 = vweird.f32 %v528_v30 }
 0x2e0   :  { %618 = vmatpush.msrb.mxu3 %v999_v3 }
 0x2e2   :  { %619 = vmatpush.msrb.mxu3 %v1004_v4 }
 0x2e4   :  { %620 = vmatpush.msrb.mxu3 %v1011_v5 }
 0x2e5   :  { %v922_v31 = vpop.eup %921 }
 0x2e6   :  { %v530_v32 = vmul.f32 %v922_v31, %v528_v30  ;;  %vm536_vm2 = vweird.f32 %v922_v31 }
 0x2e7   :  { %vm537_vm3 = vmor %vm535_vm1, %vm536_vm2 }
 0x2e8   :  { %v531_v33 = vmul.f32 %v922_v31, %v530_v32 }
 0x2ea   :  { %v532_v34 = vmul.f32 0.5, %v531_v33 }
 0x2ec   :  { %v533_v37 = vsub.f32 1.5, %v532_v34 }
 0x2ee   :  { %v534_v40 = vmul.f32 %v922_v31, %v533_v37 }
 0x2f0   :  { %v538_v44 = vsel %vm537_vm3, %v922_v31, %v534_v40 }
 0x2f1   :  { %v1150_v48 = vmul.f32 %v538_v44, %v506_v10  ;;  %v1152_v49 = vmul.f32 %v538_v44, %v503_v8  ;;  %v541_v6 = vmul.f32 %v538_v44, %v508_v13  ;;  %v1176_v19 = vmul.f32 0.0, %v538_v44 }
 0x2f3   :  { %v547_v60 = vrot.slane %v1150_v48, 1  ;;  %v548_v61 = vrot.slane %v1152_v49, 1  ;;  %v567_v11 = vrot.slane %v1152_v49, 2  ;;  %v569_v12 = vrot.slane %v541_v6, 2 }
 0x2f4   :  { %v550_v14 = vrot.slane %v541_v6, 1  ;;  %v566_v16 = vrot.slane %v1150_v48, 2  ;;  %v571_v22 = vrot.slane %v1176_v19, 2  ;;  %v552_v23 = vrot.slane %v1176_v19, 1 }
 0x2f5   :  { %v549_v2 = vsel %vm118_vm7, %v547_v60, %v548_v61  ;;  %v570_v13 = vsel %vm138_vm8, %v567_v11, %v569_v12 }
 0x2f6   :  { %v551_v17 = vsel %vm118_vm7, %v548_v61, %v550_v14  ;;  %v568_v21 = vsel %vm138_vm8, %v566_v16, %v567_v11  ;;  %v572_v24 = vsel %vm138_vm8, %v569_v12, %v571_v22  ;;  %v553_v25 = vsel %vm118_vm7, %v550_v14, %v552_v23 }
 0x34c   :  { %v394_v36 = vpop.f32.mrf.mxu2 }
 0x34d   :  { %v395_v39 = vadd.f32 %v1141_v35, %v394_v36 }
 0x34f   :  { %v403_v41 = vmax.f32 %v395_v39, 0.0 }
 0x351   :  { %v415_v46 = vsel %vm406_vm4, %v403_v41, 0.0 }
 0x352   :  { %v421_v50 = vrot.slane %v415_v46, 2  ;;  %v432_v51 = vrot.slane %v415_v46, 4 }
 0x354   :  { %v397_v42 = vpop.f32.mrf.mxu2 }
 0x355   :  { %v398_v43 = vadd.f32 %v1141_v35, %v397_v42 }
 0x357   :  { %v1148_v47 = vmax.f32 %v398_v43, 0.0 }
 0x359   :  { %v422_v53 = vrot.slane %v1148_v47, 2  ;;  %v433_v54 = vrot.slane %v1148_v47, 4 }
 0x35b   :  { %v434_v55 = vsel %vm344_vm14, %v432_v51, %v433_v54  ;;  %v423_v57 = vsel %vm138_vm8, %v421_v50, %v422_v53  ;;  %v1225_v50 = vld [vmem:[%s1345_s2 + $0x3] ss:$0 sm:$0xff] }
 0x35c   :  { %v400_v58 = vpop.f32.mrf.mxu2  ;;  %437 = vrot.lane.b32.xlu1 %v434_v55, %s924_s21  ;;  %426 = vrot.lane.b32.xlu0 %v423_v57, %s923_s20 }
 0x35d   :  { %v401_v59 = vadd.f32 %v1141_v35, %v400_v58 }
 0x35f   :  { %v405_v62 = vmax.f32 %v401_v59, 0.0 }
 0x361   :  { %v417_v0 = vsel %vm411_vm5, %v405_v62, 0.0 }
 0x362   :  { %v424_v7 = vrot.slane %v417_v0, 2  ;;  %v435_v8 = vrot.slane %v417_v0, 4 }
 0x364   :  { %v425_v9 = vsel %vm138_vm8, %v422_v53, %v424_v7  ;;  %v436_v10 = vsel %vm344_vm14, %v433_v54, %v435_v8  ;;  %554 = vrot.lane.b32.xlu1 %v549_v2, %s923_s20 }
 0x365   :  { %428 = vrot.lane.b32.xlu2 %v425_v9, %s923_s20  ;;  %439 = vrot.lane.b32.xlu0 %v436_v10, %s924_s21 }
 0x36c   :  { %575 = vrot.lane.b32.xlu1 %v570_v13, %s924_s21 }
 0x36d   :  { %556 = vrot.lane.b32.xlu0 %v551_v17, %s923_s20  ;;  %573 = vrot.lane.b32.xlu2 %v568_v21, %s924_s21 }
 0x375   :  { %577 = vrot.lane.b32.xlu0 %v572_v24, %s924_s21  ;;  %558 = vrot.lane.b32.xlu2 %v553_v25, %s923_s20 }
 0x3bf   :  { %v429_v33 = vpop.permute.xlu2 %428 }
 0x3c0   :  { %v444_v34 = vsel %vm57_vm0, %v1148_v47, %v429_v33 }
 0x3c7   :  { %v574_v5 = vpop.permute.xlu2 %573 }
 0x3ce   :  { %v438_v29 = vpop.permute.xlu1 %437  ;;  %v427_v30 = vpop.permute.xlu0 %426 }
 0x3cf   :  { %v443_v31 = vsel %vm57_vm0, %v415_v46, %v427_v30  ;;  %v559_v44 = vpop.permute.xlu2 %558 }
 0x3d0   :  { %v445_v32 = vsel %vm162_vm9, %v443_v31, %v438_v29  ;;  %v587_v46 = vsel %vm57_vm0, %v541_v6, %v559_v44 }
 0x3d1   :  { %892 = vmatmul.msk.f32.vlgmr.msra.gmra.mxu3 %vm170_vm10, %v445_v32 }
 0x3d6   :  { %v555_v3 = vpop.permute.xlu1 %554 }
 0x3d7   :  { %v440_v36 = vpop.permute.xlu0 %439  ;;  %v585_v4 = vsel %vm57_vm0, %v1150_v48, %v555_v3 }
 0x3d8   :  { %v446_v37 = vsel %vm162_vm9, %v444_v34, %v440_v36  ;;  %v589_v39 = vsel %vm162_vm9, %v585_v4, %v574_v5 }
 0x3d9   :  { %893 = vmatmul.msk.f32.gmra.mxu3 %vm170_vm10, %v446_v37 }
 0x3de   :  { %v576_v42 = vpop.permute.xlu1 %575 }
 0x3df   :  { %v557_v40 = vpop.permute.xlu0 %556 }
 0x3e0   :  { %v586_v41 = vsel %vm57_vm0, %v1152_v49, %v557_v40 }
 0x3e1   :  { %898 = vmatmul.msk.f32.vlgmr.msrb.gmra.mxu3 %vm170_vm10, %v589_v39  ;;  %v590_v43 = vsel %vm162_vm9, %v586_v41, %v576_v42 }
 0x3e7   :  { %v578_v47 = vpop.permute.xlu0 %577 }
 0x3e8   :  { %v591_v48 = vsel %vm162_vm9, %v587_v46, %v578_v47 }
 0x3e9   :  { %899 = vmatmul.msk.f32.gmra.mxu3 %vm170_vm10, %v590_v43 }
 0x3f1   :  { %900 = vmatmul.msk.f32.gmra.mxu3 %vm170_vm10, %v591_v48 }
 0x454   :  { %v473_v51 = vpop.f32.mrf.mxu3 }
 0x455   :  { %v474_v49 = vadd.f32 %v1225_v50, %v473_v51 }
 0x457   :  { %v479_v53 = vmax.f32 %v474_v49, 0.0 }
 0x459   :  { %481 = vst.msk [vmem:[%s1347_s3] sm:$0xff] %vm57_vm0, %v479_v53 }
 0x45c   :  { %v476_v54 = vpop.f32.mrf.mxu3 }
 0x45d   :  { %v477_v55 = vadd.f32 %v1225_v50, %v476_v54 }
 0x45f   :  { %v480_v57 = vmax.f32 %v477_v55, 0.0 }
 0x461   :  { %482 = vst.msk [vmem:[%s1347_s3 + $0x8] sm:$0xff] %vm57_vm0, %v480_v57 }
 0x464   :  { %v622_v58 = vpop.f32.mrf.mxu3 }
 0x465   :  { %v623_v59 = vadd.f32 %v1026_v20, %v622_v58 }
 0x467   :  { %v634_v60 = vmax.f32 %v623_v59, 0.0 }
 0x469   :  { %v638_v0 = vsel %vm216_vm11, %v634_v60, 0.0 }
 0x46a   :  { %v646_v6 = vrot.slane %v638_v0, 1  ;;  %v662_v7 = vrot.slane %v638_v0, 2 }
 0x46c   :  { %v625_v61 = vpop.f32.mrf.mxu3 }
 0x46d   :  { %v626_v62 = vadd.f32 %v1026_v20, %v625_v61 }
 0x46f   :  { %v635_v2 = vmax.f32 %v626_v62, 0.0 }
 0x471   :  { %v647_v8 = vrot.slane %v635_v2, 1  ;;  %v663_v9 = vrot.slane %v635_v2, 2 }
 0x473   :  { %v664_v10 = vsel %vm138_vm8, %v662_v7, %v663_v9  ;;  %v648_v11 = vsel %vm118_vm7, %v646_v6, %v647_v8 }
 0x474   :  { %669 = vrot.lane.b32.xlu2 %v664_v10, %s924_s21  ;;  %653 = vrot.lane.b32.xlu1 %v648_v11, %s923_s20  ;;  %v628_v12 = vpop.f32.mrf.mxu3 }
 0x475   :  { %v629_v14 = vadd.f32 %v1026_v20, %v628_v12 }
 0x477   :  { %v636_v16 = vmax.f32 %v629_v14, 0.0 }
 0x479   :  { %v640_v13 = vsel %vm222_vm12, %v636_v16, 0.0 }
 0x47a   :  { %v649_v17 = vrot.slane %v640_v13, 1  ;;  %v665_v21 = vrot.slane %v640_v13, 2 }
 0x47c   :  { %v666_v24 = vsel %vm138_vm8, %v663_v9, %v665_v21  ;;  %v652_v25 = vsel %vm118_vm7, %v649_v17, %v1039_v38  ;;  %v650_v26 = vsel %vm118_vm7, %v647_v8, %v649_v17  ;;  %v668_v20 = vsel %vm138_vm8, %v665_v21, %v1050_v45 }
 0x47d   :  { %671 = vrot.lane.b32.xlu1 %v666_v24, %s924_s21  ;;  %657 = vrot.lane.b32.xlu2 %v652_v25, %s923_s20 }
 0x47e   :  { %655 = vrot.lane.b32.xlu0 %v650_v26, %s923_s20 }
 0x486   :  { %673 = vrot.lane.b32.xlu0 %v668_v20, %s924_s21 }
 0x4ce   :  { %v670_v28 = vpop.permute.xlu2 %669 }
 0x4d7   :  { %v658_v34 = vpop.permute.xlu2 %657 }
 0x4d8   :  { %v680_v45 = vsel %vm57_vm0, %v640_v13, %v658_v34 }
 0x4e6   :  { %v654_v27 = vpop.permute.xlu1 %653 }
 0x4e7   :  { %v678_v29 = vsel %vm57_vm0, %v638_v0, %v654_v27 }
 0x4e8   :  { %v681_v30 = vsel %vm162_vm9, %v678_v29, %v670_v28 }
 0x4e9   :  { %902 = vmatmul.msk.f32.vlgmr.msrb.gmra.mxu1 %vm170_vm10, %v681_v30 }
 0x4ef   :  { %v672_v38 = vpop.permute.xlu1 %671 }
 0x4f0   :  { %v656_v31 = vpop.permute.xlu0 %655 }
 0x4f1   :  { %v679_v32 = vsel %vm57_vm0, %v635_v2, %v656_v31 }
 0x4f2   :  { %v682_v33 = vsel %vm162_vm9, %v679_v32, %v672_v38 }
 0x4f3   :  { %903 = vmatmul.msk.f32.gmra.mxu1 %vm170_vm10, %v682_v33 }
 0x4f8   :  { %v674_v36 = vpop.permute.xlu0 %673 }
 0x4f9   :  { %v683_v37 = vsel %vm162_vm9, %v680_v45, %v674_v36 }
 0x4fb   :  { %904 = vmatmul.msk.f32.gmra.mxu1 %vm170_vm10, %v683_v37 }
 0x566   :  { %v710_v3 = vpop.f32.mrf.mxu1 }
 0x567   :  { %v711_v4 = vadd.f32 %v1076_v1, %v710_v3 }
 0x569   :  { %v719_v5 = vmax.f32 %v711_v4, 0.0 }
 0x56b   :  { %v722_v41 = vsel %vm315_vm13, %v719_v5, 0.0 }
 0x56c   :  { %v728_v43 = vrot.slane %v722_v41, 2  ;;  %v742_v44 = vrot.slane %v722_v41, 4 }
 0x570   :  { %v713_v39 = vpop.f32.mrf.mxu1 }
 0x571   :  { %v714_v40 = vadd.f32 %v1076_v1, %v713_v39 }
 0x573   :  { %v720_v42 = vmax.f32 %v714_v40, 0.0 }
 0x575   :  { %v729_v46 = vrot.slane %v720_v42, 2  ;;  %v743_v47 = vrot.slane %v720_v42, 4 }
 0x577   :  { %v744_v48 = vsel %vm344_vm14, %v742_v44, %v743_v47  ;;  %v730_v51 = vsel %vm138_vm8, %v728_v43, %v729_v46 }
 0x578   :  { %747 = vrot.lane.b32.xlu2 %v744_v48, %s924_s21  ;;  %733 = vrot.lane.b32.xlu1 %v730_v51, %s923_s20  ;;  %v716_v49 = vpop.f32.mrf.mxu1 }
 0x579   :  { %v717_v53 = vadd.f32 %v1076_v1, %v716_v49 }
 0x57b   :  { %v721_v54 = vmax.f32 %v717_v53, 0.0 }
 0x57d   :  { %v724_v55 = vsel %vm320_vm15, %v721_v54, 0.0 }
 0x57e   :  { %v745_v57 = vrot.slane %v724_v55, 4  ;;  %v731_v58 = vrot.slane %v724_v55, 2 }
 0x580   :  { %737 = vrot.lane.b32.xlu2 %v731_v58, %s923_s20  ;;  %v746_v59 = vsel %vm344_vm14, %v743_v47, %v745_v57  ;;  %v732_v60 = vsel %vm138_vm8, %v729_v46, %v731_v58 }
 0x581   :  { %749 = vrot.lane.b32.xlu1 %v746_v59, %s924_s21  ;;  %735 = vrot.lane.b32.xlu0 %v732_v60, %s923_s20 }
 0x588   :  { %152 = vrot.lane.b32.xlu2 %v144_v63, %s924_s21 }
 0x589   :  { %751 = vrot.lane.b32.xlu0 %v745_v57, %s924_s21  ;;  %132 = vrot.lane.b32.xlu1 %v124_v56, %s923_s20 }
 0x590   :  { %560 = vrot.lane.b32.xlu2 %v552_v23, %s923_s20 }
 0x5d2   :  { %v748_v61 = vpop.permute.xlu2 %747 }
 0x5da   :  { %v738_v56 = vpop.permute.xlu2 %737 }
 0x5db   :  { %v758_v8 = vsel %vm57_vm0, %v724_v55, %v738_v56 }
 0x5ea   :  { %v734_v1 = vpop.permute.xlu1 %733 }
 0x5eb   :  { %v756_v62 = vsel %vm57_vm0, %v722_v41, %v734_v1 }
 0x5ec   :  { %v759_v0 = vsel %vm162_vm9, %v756_v62, %v748_v61 }
 0x5ed   :  { %905 = vmatmul.msk.f32.vlgmr.msrb.gmra.mxu2 %vm170_vm10, %v759_v0 }
 0x5f3   :  { %v750_v2 = vpop.permute.xlu1 %749  ;;  %v736_v63 = vpop.permute.xlu0 %735 }
 0x5f4   :  { %v757_v6 = vsel %vm57_vm0, %v720_v42, %v736_v63 }
 0x5f5   :  { %v760_v7 = vsel %vm162_vm9, %v757_v6, %v750_v2 }
 0x5f6   :  { %906 = vmatmul.msk.f32.gmra.mxu2 %vm170_vm10, %v760_v7 }
 0x5fb   :  { %v752_v23 = vpop.permute.xlu0 %751  ;;  %v133_v34 = vpop.permute.xlu1 %132 }
 0x5fc   :  { %v761_v9 = vsel %vm162_vm9, %v758_v8, %v752_v23  ;;  %v161_v18 = vsel %vm57_vm0, %v976_v52, %v133_v34 }
 0x5fe   :  { %907 = vmatmul.msk.f32.gmra.mxu2 %vm170_vm10, %v761_v9 }
 0x670   :  { %v788_v10 = vpop.f32.mrf.mxu2 }
 0x671   :  { %v789_v11 = vadd.f32 %v1141_v35, %v788_v10 }
 0x673   :  { %v797_v12 = vmax.f32 %v789_v11, 0.0 }
 0x675   :  { %v800_v13 = vsel %vm406_vm4, %v797_v12, 0.0 }
 0x676   :  { %v806_v21 = vrot.slane %v800_v13, 2  ;;  %v817_v24 = vrot.slane %v800_v13, 4 }
 0x679   :  { %v791_v14 = vpop.f32.mrf.mxu2 }
 0x67a   :  { %v792_v16 = vadd.f32 %v1141_v35, %v791_v14 }
 0x67c   :  { %v798_v17 = vmax.f32 %v792_v16, 0.0 }
 0x67e   :  { %v807_v25 = vrot.slane %v798_v17, 2  ;;  %v818_v26 = vrot.slane %v798_v17, 4 }
 0x680   :  { %v819_v20 = vsel %vm344_vm14, %v817_v24, %v818_v26  ;;  %v808_v27 = vsel %vm138_vm8, %v806_v21, %v807_v25 }
 0x681   :  { %822 = vrot.lane.b32.xlu1 %v819_v20, %s924_s21  ;;  %811 = vrot.lane.b32.xlu0 %v808_v27, %s923_s20  ;;  %v794_v28 = vpop.f32.mrf.mxu2 }
 0x682   :  { %v795_v29 = vadd.f32 %v1141_v35, %v794_v28  ;;  %v153_v35 = vpop.permute.xlu2 %152 }
 0x683   :  { %v166_v45 = vsel %vm162_vm9, %v161_v18, %v153_v35 }
 0x684   :  { %v799_v30 = vmax.f32 %v795_v29, 0.0  ;;  %885 = vmatmul.msk.f32.gmra.mxu0 %vm170_vm10, %v166_v45 }
 0x686   :  { %v802_v15 = vsel %vm411_vm5, %v799_v30, 0.0 }
 0x687   :  { %v809_v38 = vrot.slane %v802_v15, 2  ;;  %v820_v31 = vrot.slane %v802_v15, 4 }
 0x689   :  { %579 = vrot.lane.b32.xlu0 %v571_v22, %s924_s21  ;;  %v821_v32 = vsel %vm344_vm14, %v818_v26, %v820_v31  ;;  %v810_v33 = vsel %vm138_vm8, %v807_v25, %v809_v38 }
 0x68a   :  { %824 = vrot.lane.b32.xlu2 %v821_v32, %s924_s21  ;;  %813 = vrot.lane.b32.xlu1 %v810_v33, %s923_s20  ;;  %v561_v36 = vpop.permute.xlu2 %560 }
 0x68b   :  { %v588_v5 = vsel %vm57_vm0, %v1176_v19, %v561_v36 }
 0x6e4   :  { %v825_v41 = vpop.permute.xlu2 %824 }
 0x6f3   :  { %v823_v37 = vpop.permute.xlu1 %822  ;;  %v812_v22 = vpop.permute.xlu0 %811 }
 0x6f4   :  { %v828_v3 = vsel %vm57_vm0, %v800_v13, %v812_v22 }
 0x6f5   :  { %v830_v4 = vsel %vm162_vm9, %v828_v3, %v823_v37 }
 0x6f6   :  { %908 = vmatmul.msk.f32.vlgmr.msrb.gmra.mxu0 %vm170_vm10, %v830_v4 }
 0x6fb   :  { %v580_v39 = vpop.permute.xlu0 %579 }
 0x6fc   :  { %v814_v40 = vpop.permute.xlu1 %813  ;;  %v592_v52 = vsel %vm162_vm9, %v588_v5, %v580_v39 }
 0x6fd   :  { %v829_v42 = vsel %vm57_vm0, %v798_v17, %v814_v40  ;;  %901 = vmatmul.msk.f32.gmra.mxu3 %vm170_vm10, %v592_v52 }
 0x6fe   :  { %v831_v43 = vsel %vm162_vm9, %v829_v42, %v825_v41 }
 0x6ff   :  { %909 = vmatmul.msk.f32.gmra.mxu0 %vm170_vm10, %v831_v43 }
 0x701   :  { %v209_v44 = vpop.f32.mrf.mxu0 }
 0x773   :  { %v855_v46 = vpop.f32.mrf.mxu0 }
 0x774   :  { %v856_v47 = vadd.f32 %v1225_v50, %v855_v46 }
 0x776   :  { %v861_v48 = vmax.f32 %v856_v47, 0.0 }
 0x778   :  { %910 = vst.msk [vmem:[%s1347_s3 + $0x10] sm:$0xff] %vm57_vm0, %v861_v48 }
 0x77c   :  { %v858_v19 = vpop.f32.mrf.mxu0 }
 0x77d   :  { %v859_v51 = vadd.f32 %v1225_v50, %v858_v19 }
 0x77f   :  { %v862_v49 = vmax.f32 %v859_v51, 0.0 }
 0x780   :  { %v631_v53 = vpop.f32.mrf.mxu3 }
 0x781   :  { %911 = vst.msk [vmem:[%s1347_s3 + $0x18] sm:$0xff] %vm57_vm0, %v862_v49 }

</bundles_post_ra>
